<compile_context>
chip_gen: v5e
topology: v5e:2x2
jax: 0.10.0
libtpu: 0.0.40
codegen_flags: <defaults>
</compile_context>

<pallas_src>
import functools

import jax
import jax.numpy as jnp
from jax.experimental import pallas as pl
from jax.experimental.pallas import tpu as pltpu

_LANES = 128
_SUBLANES = 8
_TARGET_TILE_BYTES = 2 << 20  # ~2 MiB per input tile


# ----------------------------- helpers ---------------------------------------

def _pick_block_rows(batch, dim, itemsize, override=None):
    """Rows per tile: big enough to amortize per-step overhead (~0.35 us/step),
    small enough that 2 inputs x 2 pipeline buffers stay well under scoped
    VMEM on all generations (v5e 16 MiB scoped default, v7x 64 MiB physical)."""
    if override is not None:
        tb = int(override)
    else:
        tb = max(_SUBLANES, _TARGET_TILE_BYTES // max(dim * itemsize, 1))
    if tb >= batch:
        return batch  # full-extent block dim is always legal
    return max(_SUBLANES, (tb // _SUBLANES) * _SUBLANES)  # multiple of 8 sublanes


def _row_mask(tb, n_rows):
    """(tb, 1) mask of in-bounds rows for the current grid step (ragged edge)."""
    start = pl.program_id(0) * tb
    rows = start + jax.lax.broadcasted_iota(jnp.int32, (tb, 1), 0)
    return rows < n_rows


# ----------------------------- kernels ---------------------------------------

def _mean_reduce_kernel(x_ref, y_ref, o_ref, acc_ref, *, use_abs, inv_n, tb, n_rows):
    """MSE / MAE: SMEM scalar accumulator across the batch grid axis."""
    @pl.when(pl.program_id(0) == 0)
    def _init():
        acc_ref[0] = jnp.float32(0.0)

    x = x_ref[...].astype(jnp.float32)
    y = y_ref[...].astype(jnp.float32)
    d = x - y
    v = jnp.abs(d) if use_abs else d * d
    if n_rows % tb:  # ragged last tile: zero out padded rows before reducing
        v = jnp.where(_row_mask(tb, n_rows), v, 0.0)
    acc_ref[0] += jnp.sum(v)

    @pl.when(pl.program_id(0) == pl.num_programs(0) - 1)
    def _finalize():
        o_ref[0] = acc_ref[0] * jnp.float32(inv_n)


def _cosine_kernel(x_ref, y_ref, o_ref):
    """1 - cosine_similarity(x, y, dim=1), eps=1e-8 (PyTorch per-norm clamp).
    Output is a lane-dense (tb, 128) slab (value broadcast across lanes)."""
    x = x_ref[...].astype(jnp.float32)
    y = y_ref[...].astype(jnp.float32)
    dot = jnp.sum(x * y, axis=-1, keepdims=True)
    nx = jnp.sqrt(jnp.sum(x * x, axis=-1, keepdims=True))
    ny = jnp.sqrt(jnp.sum(y * y, axis=-1, keepdims=True))
    eps = jnp.float32(1e-8)
    cos = dot / (jnp.maximum(nx, eps) * jnp.maximum(ny, eps))
    o_ref[...] = jnp.broadcast_to(1.0 - cos, o_ref.shape)


def _fused_kernel(x_ref, y_ref, mse_ref, mae_ref, cos_ref, acc_ref,
                  *, inv_n, tb, n_rows):
    """All three losses in one pass over (x, y): x, y read from HBM once."""
    @pl.when(pl.program_id(0) == 0)
    def _init():
        acc_ref[0] = jnp.float32(0.0)
        acc_ref[1] = jnp.float32(0.0)

    x = x_ref[...].astype(jnp.float32)
    y = y_ref[...].astype(jnp.float32)
    d = x - y
    sq = d * d
    ab = jnp.abs(d)
    if n_rows % tb:
        m = _row_mask(tb, n_rows)
        sq = jnp.where(m, sq, 0.0)
        ab = jnp.where(m, ab, 0.0)
    acc_ref[0] += jnp.sum(sq)
    acc_ref[1] += jnp.sum(ab)

    dot = jnp.sum(x * y, axis=-1, keepdims=True)
    nx = jnp.sqrt(jnp.sum(x * x, axis=-1, keepdims=True))
    ny = jnp.sqrt(jnp.sum(y * y, axis=-1, keepdims=True))
    eps = jnp.float32(1e-8)
    cos = dot / (jnp.maximum(nx, eps) * jnp.maximum(ny, eps))
    cos_ref[...] = jnp.broadcast_to(1.0 - cos, cos_ref.shape)

    @pl.when(pl.program_id(0) == pl.num_programs(0) - 1)
    def _finalize():
        mse_ref[0] = acc_ref[0] * jnp.float32(inv_n)
        mae_ref[0] = acc_ref[1] * jnp.float32(inv_n)


# ----------------------------- wrappers ---------------------------------------

def direction_loss(x, y, loss_type="mse", block_rows=None):
    """Pallas implementation of DirectionLoss(loss_type).forward(x, y)."""
    assert x.shape == y.shape and x.ndim == 2, "expect (batch, dim) inputs"
    B, D = x.shape
    tb = _pick_block_rows(B, D, x.dtype.itemsize, block_rows)
    grid = (pl.cdiv(B, tb),)
    in_spec = pl.BlockSpec((tb, D), lambda i: (i, 0))
    out_dtype = jnp.result_type(x.dtype, y.dtype)

    if loss_type in ("mse", "mae"):
        kern = functools.partial(
            _mean_reduce_kernel,
            use_abs=(loss_type == "mae"),
            inv_n=1.0 / float(B * D),
            tb=tb, n_rows=B)
        out = pl.pallas_call(
            kern,
            out_shape=jax.ShapeDtypeStruct((1,), jnp.float32),
            grid=grid,
            in_specs=[in_spec, in_spec],
            out_specs=pl.BlockSpec(memory_space=pltpu.MemorySpace.SMEM),
            scratch_shapes=[pltpu.SMEM((1,), jnp.float32)],
            compiler_params=pltpu.CompilerParams(
                dimension_semantics=("arbitrary",)),  # accumulator axis
        )(x, y)
        return out[0].astype(out_dtype)  # 0-d scalar, like torch reduction='mean'

    elif loss_type == "cosine":
        out = pl.pallas_call(
            _cosine_kernel,
            out_shape=jax.ShapeDtypeStruct((B, _LANES), jnp.float32),
            grid=grid,
            in_specs=[in_spec, in_spec],
            out_specs=pl.BlockSpec((tb, _LANES), lambda i: (i, 0)),
            compiler_params=pltpu.CompilerParams(
                dimension_semantics=("parallel",)),  # independent tiles (v7x 2xTC)
        )(x, y)
        return out[:, 0].astype(out_dtype)  # (B,), like torch CosineSimilarity(dim=1)

    else:
        raise ValueError(f"unknown loss_type {loss_type!r}")


def direction_loss_fused(x, y, block_rows=None):
    """All three DirectionLoss variants in a single pass over (x, y)."""
    assert x.shape == y.shape and x.ndim == 2, "expect (batch, dim) inputs"
    B, D = x.shape
    tb = _pick_block_rows(B, D, x.dtype.itemsize, block_rows)
    grid = (pl.cdiv(B, tb),)
    in_spec = pl.BlockSpec((tb, D), lambda i: (i, 0))
    smem_out = pl.BlockSpec(memory_space=pltpu.MemorySpace.SMEM)
    out_dtype = jnp.result_type(x.dtype, y.dtype)

    kern = functools.partial(_fused_kernel, inv_n=1.0 / float(B * D), tb=tb, n_rows=B)
    mse, mae, cos = pl.pallas_call(
        kern,
        out_shape=(jax.ShapeDtypeStruct((1,), jnp.float32),
                   jax.ShapeDtypeStruct((1,), jnp.float32),
                   jax.ShapeDtypeStruct((B, _LANES), jnp.float32)),
        grid=grid,
        in_specs=[in_spec, in_spec],
        out_specs=(smem_out, smem_out,
                   pl.BlockSpec((tb, _LANES), lambda i: (i, 0))),
        scratch_shapes=[pltpu.SMEM((2,), jnp.float32)],
        compiler_params=pltpu.CompilerParams(
            dimension_semantics=("arbitrary",)),  # scalar accumulators present
    )(x, y)
    return {"mse": mse[0].astype(out_dtype),
            "mae": mae[0].astype(out_dtype),
            "cosine": cos[:, 0].astype(out_dtype)}


# ----------------------------- demo / check -----------------------------------

if __name__ == "__main__":
    key = jax.random.PRNGKey(0)
    kx, ky = jax.random.split(key)

    def refs(x, y):
        eps = 1e-8
        mse_r = jnp.mean((x - y) ** 2)
        mae_r = jnp.mean(jnp.abs(x - y))
        cos_r = 1.0 - jnp.sum(x * y, -1) / (
            jnp.maximum(jnp.linalg.norm(x, axis=-1), eps)
            * jnp.maximum(jnp.linalg.norm(y, axis=-1), eps))
        return mse_r, mae_r, cos_r

    # small (batch, embed_dim) consistent with CLIP direction vectors
    B, D = 8, 512
    x = jax.random.normal(kx, (B, D), dtype=jnp.float32)
    y = jax.random.normal(ky, (B, D), dtype=jnp.float32)

    mse = direction_loss(x, y, "mse")
    mae = direction_loss(x, y, "mae")
    cos = direction_loss(x, y, "cosine")
    fused = direction_loss_fused(x, y)
    jax.block_until_ready((mse, mae, cos, fused))

    mse_r, mae_r, cos_r = refs(x, y)
    assert jnp.allclose(mse, mse_r, atol=1e-5, rtol=1e-5)
    assert jnp.allclose(mae, mae_r, atol=1e-5, rtol=1e-5)
    assert jnp.allclose(cos, cos_r, atol=1e-5, rtol=1e-5)
    assert jnp.allclose(fused["mse"], mse_r, atol=1e-5, rtol=1e-5)
    assert jnp.allclose(fused["mae"], mae_r, atol=1e-5, rtol=1e-5)
    assert jnp.allclose(fused["cosine"], cos_r, atol=1e-5, rtol=1e-5)

    # multi-tile + ragged-edge path (forces grid > 1 and row masking)
    B2 = 20
    x2 = jax.random.normal(kx, (B2, D), dtype=jnp.float32)
    y2 = jax.random.normal(ky, (B2, D), dtype=jnp.float32)
    mse2 = direction_loss(x2, y2, "mse", block_rows=8)
    mae2 = direction_loss(x2, y2, "mae", block_rows=8)
    cos2 = direction_loss(x2, y2, "cosine", block_rows=8)
    fused2 = direction_loss_fused(x2, y2, block_rows=8)
    jax.block_until_ready((mse2, mae2, cos2, fused2))

    mse2_r, mae2_r, cos2_r = refs(x2, y2)
    assert jnp.allclose(mse2, mse2_r, atol=1e-5, rtol=1e-5)
    assert jnp.allclose(mae2, mae2_r, atol=1e-5, rtol=1e-5)
    assert jnp.allclose(cos2, cos2_r, atol=1e-5, rtol=1e-5)
    assert jnp.allclose(fused2["mse"], mse2_r, atol=1e-5, rtol=1e-5)
    assert jnp.allclose(fused2["mae"], mae2_r, atol=1e-5, rtol=1e-5)
    assert jnp.allclose(fused2["cosine"], cos2_r, atol=1e-5, rtol=1e-5)

    # bf16 input path (accumulation stays f32 in-kernel)
    xb = x.astype(jnp.bfloat16)
    yb = y.astype(jnp.bfloat16)
    mse_b = direction_loss(xb, yb, "mse")
    jax.block_until_ready(mse_b)
    assert jnp.allclose(mse_b.astype(jnp.float32),
                        jnp.mean((xb.astype(jnp.float32) - yb.astype(jnp.float32)) ** 2),
                        atol=2e-2, rtol=2e-2)

    print("KERNEL_OK")
</pallas_src>

<mosaic_0001>
module attributes {stable_mosaic.version = 11 : i64} {
  func.func @_mean_reduce_kernel(%arg0: i32, %arg1: memref<8x512xf32, #tpu.memory_space<vmem>>, %arg2: memref<8x512xf32, #tpu.memory_space<vmem>>, %arg3: memref<1xf32, #tpu.memory_space<smem>>, %arg4: memref<1xf32, #tpu.memory_space<smem>>) attributes {dimension_semantics = [#tpu.dimension_semantics<arbitrary>], iteration_bounds = array<i64: 1>, scalar_prefetch = 0 : i64, scratch_operands = 1 : i64, tpu.core_type = #tpu.core_type<tc>, window_params = [{transform_indices = @transform_0, window_bounds = array<i64: 8, 512>}, {transform_indices = @transform_1, window_bounds = array<i64: 8, 512>}, {transform_indices = @transform_2, window_bounds = array<i64: 1>}]} {
    %c0_i32 = arith.constant 0 : i32
    %0 = arith.cmpi eq, %arg0, %c0_i32 : i32
    %1 = arith.extui %0 : i1 to i32
    %c0_i32_0 = arith.constant 0 : i32
    %2 = arith.cmpi ne, %1, %c0_i32_0 : i32
    scf.if %2 {
      %cst_8 = arith.constant 0.000000e+00 : f32
      %c0_9 = arith.constant 0 : index
      %17 = memref.load %arg4[%c0_9] : memref<1xf32, #tpu.memory_space<smem>>
      memref.store %cst_8, %arg4[%c0_9] : memref<1xf32, #tpu.memory_space<smem>>
    } else {
    }
    %c0 = arith.constant 0 : index
    %c0_1 = arith.constant 0 : index
    %3 = vector.load %arg1[%c0, %c0_1] : memref<8x512xf32, #tpu.memory_space<vmem>>, vector<8x512xf32>
    %c0_2 = arith.constant 0 : index
    %c0_3 = arith.constant 0 : index
    %4 = vector.load %arg2[%c0_2, %c0_3] : memref<8x512xf32, #tpu.memory_space<vmem>>, vector<8x512xf32>
    %5 = arith.subf %3, %4 : vector<8x512xf32>
    %6 = arith.mulf %5, %5 : vector<8x512xf32>
    %c0_4 = arith.constant 0 : index
    %7 = memref.load %arg4[%c0_4] : memref<1xf32, #tpu.memory_space<smem>>
    %8 = vector.shape_cast %6 : vector<8x512xf32> to vector<1x8x512xf32>
    %cst = arith.constant dense<0.000000e+00> : vector<1xf32>
    %9 = vector.multi_reduction <add>, %8, %cst [1, 2] : vector<1x8x512xf32> to vector<1xf32>
    %10 = vector.shape_cast %9 : vector<1xf32> to vector<1x1x1xf32>
    %11 = vector.extract %10[0, 0, 0] : f32 from vector<1x1x1xf32>
    %12 = arith.addf %7, %11 : f32
    %c0_5 = arith.constant 0 : index
    %13 = memref.load %arg4[%c0_5] : memref<1xf32, #tpu.memory_space<smem>>
    memref.store %12, %arg4[%c0_5] : memref<1xf32, #tpu.memory_space<smem>>
    %c0_i32_6 = arith.constant 0 : i32
    %14 = arith.cmpi eq, %arg0, %c0_i32_6 : i32
    %15 = arith.extui %14 : i1 to i32
    %c0_i32_7 = arith.constant 0 : i32
    %16 = arith.cmpi ne, %15, %c0_i32_7 : i32
    scf.if %16 {
      %c0_8 = arith.constant 0 : index
      %17 = memref.load %arg4[%c0_8] : memref<1xf32, #tpu.memory_space<smem>>
      %cst_9 = arith.constant 2.44140625E-4 : f32
      %18 = arith.mulf %17, %cst_9 : f32
      %c0_10 = arith.constant 0 : index
      %19 = memref.load %arg3[%c0_10] : memref<1xf32, #tpu.memory_space<smem>>
      memref.store %18, %arg3[%c0_10] : memref<1xf32, #tpu.memory_space<smem>>
    } else {
    }
    return
  }
  func.func @transform_0(%arg0: i32) -> (i32, i32) {
    %c0_i32 = arith.constant 0 : i32
    %c0_i32_0 = arith.constant 0 : i32
    return %arg0, %c0_i32 : i32, i32
  }
  func.func @transform_1(%arg0: i32) -> (i32, i32) {
    %c0_i32 = arith.constant 0 : i32
    %c0_i32_0 = arith.constant 0 : i32
    return %arg0, %c0_i32 : i32, i32
  }
  func.func @transform_2(%arg0: i32) -> i32 {
    %c0_i32 = arith.constant 0 : i32
    %c0_i32_0 = arith.constant 0 : i32
    return %c0_i32 : i32
  }
}

</mosaic_0001>

<bundles_post_ra>
// kernel: tpu_custom_call.1
= control target key start
LH: loop header
LB: loop body
LE: loop exit
PB: predicated region body
PF: predicated region fallthrough
CT: control target
= control target key end

     0   :  { %7 = vsyncpa [#allocation4], 0  ;;  %s200_s0 = inlined_call_operand.hbm [shape: f32[8,512], index: 0, kind: input, shape index: {}]   ;;  %s201_s1 = inlined_call_operand.hbm [shape: f32[8,512], index: 1, kind: input, shape index: {}]   ;;  %s202_s2 = inlined_call_operand.hbm [shape: f32[1], index: 2, kind: output, shape index: {}]  }
   0x1   :  { %8 = vsyncpa [#allocation7], 0 }
   0x2   :  { %9 = vsyncpa [#allocation5], 0  ;;  %s15_s11 = sshll.u32 %s200_s0, 4  ;;  %s173_s12 = smov [#allocation3]   ;;  %s16_s11 = int_to_ptr.hbm [resolvable:$true] %s15_s11 }
   0x3   :  { %s17_s13 = sshll.u32 %s173_s12, 4  ;;  %s26_s16 = sshll.u32 %s201_s1, 4  ;;  %s18_s13 = int_to_ptr.vmem [resolvable:$true] %s17_s13  ;;  %s27_s16 = int_to_ptr.hbm [resolvable:$true] %s26_s16 }
   0x4   :  { %20 = dma.hbm_to_vmem [thread:$0]  %s16_s11, 512, %s18_s13, [#allocation4]  }
   0x5   :  { %s174_s17 = smov [#allocation6]  }
   0x6   :  { %s28_s18 = sshll.u32 %s174_s17, 4  ;;  %s29_s18 = int_to_ptr.vmem [resolvable:$true] %s28_s18 }
   0x7   :  { %31 = dma.hbm_to_vmem [thread:$0]  %s27_s16, 512, %s29_s18, [#allocation7]  }
   0x8   :  { %167 = dma.done.wait [#allocation4], 512  }
   0x9   :  { %168 = vsyncadd [#allocation4], 4294966784 }
   0xa   :  { %169 = dma.done.wait [#allocation7], 512  }
   0xb   :  { %170 = vsyncadd [#allocation7], 4294966784  ;;  %v46_v0 = vld [vmem:[#allocation3] sm:$0xff]  ;;  %v47_v1 = vld [vmem:[#allocation3 + $0x8] sm:$0xff]  ;;  %s90_s19 = sshll.u32 %s202_s2, 4  ;;  %s175_s22 = smov [#allocation8]   ;;  %s91_s19 = int_to_ptr.hbm [resolvable:$true] %s90_s19 }
   0xc   :  { %v48_v2 = vld [vmem:[#allocation3 + $0x10] sm:$0xff]  ;;  %v49_v3 = vld [vmem:[#allocation3 + $0x18] sm:$0xff]  ;;  %v50_v4 = vld [vmem:[#allocation6] sm:$0xff] }
   0xd   :  { %v51_v5 = vld [vmem:[#allocation6 + $0x8] sm:$0xff]  ;;  %v52_v6 = vld [vmem:[#allocation6 + $0x10] sm:$0xff]  ;;  %v53_v7 = vld [vmem:[#allocation6 + $0x18] sm:$0xff]  ;;  %v54_v8 = vsub.f32 %v46_v0, %v50_v4 }
   0xe   :  { %v55_v9 = vsub.f32 %v47_v1, %v51_v5  ;;  %v56_v10 = vsub.f32 %v48_v2, %v52_v6  ;;  %v57_v11 = vsub.f32 %v49_v3, %v53_v7 }
   0xf   :  { %v58_v12 = vmul.f32 %v54_v8, %v54_v8 }
  0x10   :  { %v59_v13 = vmul.f32 %v55_v9, %v55_v9  ;;  %v60_v14 = vmul.f32 %v56_v10, %v56_v10  ;;  %v61_v15 = vmul.f32 %v57_v11, %v57_v11 }
  0x12   :  { %v63_v16 = vadd.f32 %v59_v13, %v58_v12 }
  0x14   :  { %v64_v17 = vadd.f32 %v63_v16, %v60_v14 }
  0x16   :  { %v65_v18 = vadd.f32 %v64_v17, %v61_v15 }
  0x18   :  { %66 = vadd.xlane.f32.xlu0 %v65_v18 }
  0x8b   :  { %v67_v19 = vpop.xlane.xlu0 %66 }
  0x8c   :  { %v68_v20 = vrot.slane %v67_v19, 4 }
  0x8e   :  { %v69_v21 = vadd.f32 %v68_v20, %v67_v19 }
  0x90   :  { %v70_v22 = vrot.slane %v69_v21, 2 }
  0x92   :  { %v71_v23 = vadd.f32 %v70_v22, %v69_v21 }
  0x94   :  { %v72_v24 = vrot.slane %v71_v23, 1 }
  0x96   :  { %v73_v25 = vadd.f32 %v72_v24, %v71_v23 }
  0x98   :  { %102 = vpush %v73_v25 }
  0xc9   :  { %s103_s20 = spop %102 }
  0xca   :  { %s82_s21 = smul.f32 0.00024414063, %s103_s20 }
  0xcc   :  { %84 = sst [smem:[#allocation8]] %s82_s21 }
  0xcd   :  { %93 = dma.smem_to_hbm %s175_s22, 16, %s91_s19, [#allocation5]  }
  0xce   :  { %171 = dma.done.wait [#allocation5], 16  }
  0xcf   :  { %172 = vsyncadd [#allocation5], 4294967280 }
  0xd0   :  { %98 = sfence }
  0xd1   :  { %99 = vsyncpa [#allocation4], 1 }
  0xd2   :  { %100 = vsyncpa [#allocation7], 1 }
  0xd3   :  { %101 = vsyncpa [#allocation5], 1 }

</bundles_post_ra>
